<compile_context>
chip_gen: v6e
topology: v6e:2x2x1
jax: 0.10.0
libtpu: 0.0.40
codegen_flags: <defaults>
</compile_context>

<pallas_src>
import math

import jax
import jax.numpy as jnp
from jax.experimental import pallas as pl
from jax.experimental.pallas import tpu as pltpu


def _round_up(n, m):
    return pl.cdiv(n, m) * m


def _mlp_kernel(x_ref, w1_ref, w2_ref, w3_ref, o_ref):
    # Whole hot path (3 matmuls + 2 ReLUs) stays in VMEM / on the MXU for one batch tile.
    # x arrives as unpadded f32; cast to bf16 on the VPU (free slot) right before the MXU.
    x = x_ref[...].astype(w1_ref.dtype)
    h1 = jnp.dot(x, w1_ref[...], preferred_element_type=jnp.float32)     # (bt, Hp)
    h1 = jnp.maximum(h1, 0.0).astype(x.dtype)                            # bf16-feed layer 2
    h2 = jnp.dot(h1, w2_ref[...], preferred_element_type=jnp.float32)    # (bt, Hp)
    h2 = jnp.maximum(h2, 0.0).astype(x.dtype)
    o = jnp.dot(h2, w3_ref[...], preferred_element_type=jnp.float32)     # (bt, Op)
    o_ref[...] = o.astype(o_ref.dtype)


def preprocess_weights(w1, w2, w3, compute_dtype=jnp.bfloat16):
    """One-time (model-load) weight prep.

    Takes PyTorch-layout (out, in) matrices, returns bf16 (in, out)-layout matrices with the
    out-dims zero-padded to multiples of 128 (exact: padded rows/cols contribute 0, ReLU(0)=0).
      w1 (H, 784) -> (784, Hp);  w2 (H, H) -> (Hp, Hp);  w3 (O, H) -> (Hp, Op)
    """
    H, D = w1.shape
    assert w2.shape == (H, H) and w3.shape[1] == H
    O = w3.shape[0]
    Hp = _round_up(H, 128)
    Op = _round_up(O, 128)
    cd = compute_dtype
    w1t = jnp.pad(w1.astype(cd).T, ((0, 0), (0, Hp - H)))          # (D,  Hp)
    w2t = jnp.pad(w2.astype(cd).T, ((0, Hp - H), (0, Hp - H)))     # (Hp, Hp)
    w3t = jnp.pad(w3.astype(cd).T, ((0, Hp - H), (0, Op - O)))     # (Hp, Op)
    return w1t, w2t, w3t


def _const_weight_spec(block_shape):
    """Weight tile is constant across grid steps -> a single VMEM buffer suffices."""
    try:
        return pl.BlockSpec(block_shape, lambda i: (0, 0), pipeline_mode=pl.Buffered(1))
    except TypeError:  # older jax without pipeline_mode: fall back to default double buffer
        return pl.BlockSpec(block_shape, lambda i: (0, 0))


def mlp_forward(x, w1t, w2t, w3t, *, batch_tile=128, min_grid_steps=4):
    """x: (B, 784) float32 (unpadded); w*t: bf16 (in, out)-layout from preprocess_weights.

    Returns (B, O_unpadded_is_caller's_problem? no) -> (B, Op) sliced back to (B, O) by caller?
    This function returns the full padded (B, Op); the __main__ demo slices to the true O.
    """
    B, D = x.shape
    Din, Hp = w1t.shape
    assert Din == D and w2t.shape == (Hp, Hp) and w3t.shape[0] == Hp
    Op = w3t.shape[1]

    # Batch tile: >= min_grid_steps grid steps (>= 2 per v7x TensorCore) for DMA/compute
    # overlap; multiple of 8 (sublanes); capped so f32 intermediates don't pressure vregs.
    bt = min(batch_tile, max(8, _round_up(pl.cdiv(B, min_grid_steps), 8)))
    Bp = _round_up(B, bt)
    xp = jnp.pad(x, ((0, Bp - B), (0, 0))) if Bp != B else x

    # VMEM budget: 1x resident weights + double-buffered x/out tiles, plus headroom.
    weight_bytes = (w1t.size + w2t.size + w3t.size) * w1t.dtype.itemsize
    io_bytes = 2 * (bt * D * x.dtype.itemsize + bt * Op * 4)
    vmem_limit = max(int(1.25 * (weight_bytes + io_bytes)) + (4 << 20), 32 << 20)
    vmem_limit = min(vmem_limit, 100 << 20)

    # TODO(synk): for production-sized H (>= ~2048, esp. on v7x's 64 MiB VMEM) add a trailing
    # "arbitrary" K-split grid axis with a VMEM f32 accumulator + pl.when init/finalize,
    # streaming (tk, N) weight slabs instead of keeping whole weight matrices resident.
    out = pl.pallas_call(
        _mlp_kernel,
        out_shape=jax.ShapeDtypeStruct((Bp, Op), jnp.float32),
        grid=(Bp // bt,),
        in_specs=[
            pl.BlockSpec((bt, D), lambda i: (i, 0)),     # streamed f32 activations, unpadded D
            _const_weight_spec((D, Hp)),                  # resident weights, single-buffered
            _const_weight_spec((Hp, Hp)),
            _const_weight_spec((Hp, Op)),
        ],
        out_specs=pl.BlockSpec((bt, Op), lambda i: (i, 0)),   # lane-dense (Op = k*128) stores
        compiler_params=pltpu.CompilerParams(
            dimension_semantics=("parallel",),            # batch axis feeds both v7x TCs
            vmem_limit_bytes=vmem_limit,
        ),
    )(xp, w1t, w2t, w3t)

    return out[:B]


def _ref_forward(x, w1, w2, w3, compute_dtype=jnp.bfloat16):
    # Apples-to-apples reference: same bf16 operands, f32 accumulation, PyTorch (out,in) weights.
    cd = compute_dtype
    xc = x.astype(cd)
    h1 = jnp.maximum(
        jnp.dot(xc, w1.astype(cd).T, preferred_element_type=jnp.float32), 0.0
    ).astype(cd)
    h2 = jnp.maximum(
        jnp.dot(h1, w2.astype(cd).T, preferred_element_type=jnp.float32), 0.0
    ).astype(cd)
    return jnp.dot(h2, w3.astype(cd).T, preferred_element_type=jnp.float32)


if __name__ == "__main__":
    # MNIST input dim 784, hidden=32, outputs=10.  B=256 with min_grid_steps=4 -> bt=64,
    # a 4-step "parallel" grid (pipelining + both v7x TensorCores get >= 2 steps each).
    B, D, H, O = 256, 784, 32, 10

    key = jax.random.PRNGKey(0)
    kx, k1, k2, k3 = jax.random.split(key, 4)
    x = jax.random.normal(kx, (B, D), dtype=jnp.float32)
    # Deterministic init, PyTorch (out_features, in_features) shapes, no biases.
    w1 = jax.random.normal(k1, (H, D), dtype=jnp.float32) * (1.0 / math.sqrt(D))
    w2 = jax.random.normal(k2, (H, H), dtype=jnp.float32) * (1.0 / math.sqrt(H))
    w3 = jax.random.normal(k3, (O, H), dtype=jnp.float32) * (1.0 / math.sqrt(H))

    # One-time weight preprocessing (model-load time); cached device arrays reused per call.
    w1t, w2t, w3t = jax.block_until_ready(preprocess_weights(w1, w2, w3))

    fwd = jax.jit(mlp_forward, static_argnames=("batch_tile", "min_grid_steps"))
    out_padded = jax.block_until_ready(fwd(x, w1t, w2t, w3t))
    out = out_padded[:, :O]

    ref = _ref_forward(x, w1, w2, w3)
    assert out.shape == (B, O)
    assert bool(jnp.all(out_padded[:, O:] == 0.0)), "padded output columns must be exactly 0"
    assert jnp.allclose(out, ref, atol=2e-2, rtol=2e-2), "mismatch vs bf16/f32-acc reference"

    print("KERNEL_OK")
</pallas_src>

<mosaic_0001>
module attributes {stable_mosaic.version = 11 : i64} {
  func.func @_mlp_kernel(%arg0: i32, %arg1: memref<64x784xf32, #tpu.memory_space<vmem>>, %arg2: memref<784x128xbf16, #tpu.memory_space<vmem>>, %arg3: memref<128x128xbf16, #tpu.memory_space<vmem>>, %arg4: memref<128x128xbf16, #tpu.memory_space<vmem>>, %arg5: memref<64x128xf32, #tpu.memory_space<vmem>>) attributes {dimension_semantics = [#tpu.dimension_semantics<parallel>], iteration_bounds = array<i64: 4>, scalar_prefetch = 0 : i64, scratch_operands = 0 : i64, tpu.core_type = #tpu.core_type<tc>, window_params = [{transform_indices = @transform_0, window_bounds = array<i64: 64, 784>}, {pipeline_mode = #tpu.pipeline_mode<synchronous>, transform_indices = @transform_1, window_bounds = array<i64: 784, 128>}, {pipeline_mode = #tpu.pipeline_mode<synchronous>, transform_indices = @transform_2, window_bounds = array<i64: 128, 128>}, {pipeline_mode = #tpu.pipeline_mode<synchronous>, transform_indices = @transform_3, window_bounds = array<i64: 128, 128>}, {transform_indices = @transform_4, window_bounds = array<i64: 64, 128>}]} {
    %c0 = arith.constant 0 : index
    %c0_0 = arith.constant 0 : index
    %0 = vector.load %arg1[%c0, %c0_0] : memref<64x784xf32, #tpu.memory_space<vmem>>, vector<64x784xf32>
    %1 = arith.truncf %0 : vector<64x784xf32> to vector<64x784xbf16>
    %c0_1 = arith.constant 0 : index
    %c0_2 = arith.constant 0 : index
    %2 = vector.load %arg2[%c0_1, %c0_2] : memref<784x128xbf16, #tpu.memory_space<vmem>>, vector<784x128xbf16>
    %cst = arith.constant dense<0.000000e+00> : vector<64x128xf32>
    %3 = tpu.matmul %1, %2, %cst {dimension_numbers = #tpu.dot_dimension_numbers<[1], [0], [0], [1], [0, 0, 1, 1], [], []>} : vector<64x784xbf16>, vector<784x128xbf16>, vector<64x128xf32> -> vector<64x128xf32>
    %cst_3 = arith.constant 0.000000e+00 : f32
    %4 = vector.broadcast %cst_3 : f32 to vector<64x128xf32>
    %5 = arith.maximumf %3, %4 : vector<64x128xf32>
    %6 = arith.truncf %5 : vector<64x128xf32> to vector<64x128xbf16>
    %c0_4 = arith.constant 0 : index
    %c0_5 = arith.constant 0 : index
    %7 = vector.load %arg3[%c0_4, %c0_5] : memref<128x128xbf16, #tpu.memory_space<vmem>>, vector<128x128xbf16>
    %cst_6 = arith.constant dense<0.000000e+00> : vector<64x128xf32>
    %8 = tpu.matmul %6, %7, %cst_6 {dimension_numbers = #tpu.dot_dimension_numbers<[1], [0], [0], [1], [0, 0, 1, 1], [], []>} : vector<64x128xbf16>, vector<128x128xbf16>, vector<64x128xf32> -> vector<64x128xf32>
    %cst_7 = arith.constant 0.000000e+00 : f32
    %9 = vector.broadcast %cst_7 : f32 to vector<64x128xf32>
    %10 = arith.maximumf %8, %9 : vector<64x128xf32>
    %11 = arith.truncf %10 : vector<64x128xf32> to vector<64x128xbf16>
    %c0_8 = arith.constant 0 : index
    %c0_9 = arith.constant 0 : index
    %12 = vector.load %arg4[%c0_8, %c0_9] : memref<128x128xbf16, #tpu.memory_space<vmem>>, vector<128x128xbf16>
    %cst_10 = arith.constant dense<0.000000e+00> : vector<64x128xf32>
    %13 = tpu.matmul %11, %12, %cst_10 {dimension_numbers = #tpu.dot_dimension_numbers<[1], [0], [0], [1], [0, 0, 1, 1], [], []>} : vector<64x128xbf16>, vector<128x128xbf16>, vector<64x128xf32> -> vector<64x128xf32>
    %c0_11 = arith.constant 0 : index
    %c0_12 = arith.constant 0 : index
    %14 = vector.load %arg5[%c0_11, %c0_12] : memref<64x128xf32, #tpu.memory_space<vmem>>, vector<64x128xf32>
    tpu.vector_store %arg5[%c0_11, %c0_12], %13 {strides = array<i32>} : memref<64x128xf32, #tpu.memory_space<vmem>>, vector<64x128xf32>,
    return
  }
  func.func @transform_0(%arg0: i32) -> (i32, i32) {
    %c0_i32 = arith.constant 0 : i32
    %c0_i32_0 = arith.constant 0 : i32
    return %arg0, %c0_i32 : i32, i32
  }
  func.func @transform_1(%arg0: i32) -> (i32, i32) {
    %c0_i32 = arith.constant 0 : i32
    %c0_i32_0 = arith.constant 0 : i32
    %c0_i32_1 = arith.constant 0 : i32
    return %c0_i32, %c0_i32_0 : i32, i32
  }
  func.func @transform_2(%arg0: i32) -> (i32, i32) {
    %c0_i32 = arith.constant 0 : i32
    %c0_i32_0 = arith.constant 0 : i32
    %c0_i32_1 = arith.constant 0 : i32
    return %c0_i32, %c0_i32_0 : i32, i32
  }
  func.func @transform_3(%arg0: i32) -> (i32, i32) {
    %c0_i32 = arith.constant 0 : i32
    %c0_i32_0 = arith.constant 0 : i32
    %c0_i32_1 = arith.constant 0 : i32
    return %c0_i32, %c0_i32_0 : i32, i32
  }
  func.func @transform_4(%arg0: i32) -> (i32, i32) {
    %c0_i32 = arith.constant 0 : i32
    %c0_i32_0 = arith.constant 0 : i32
    return %arg0, %c0_i32 : i32, i32
  }
}

</mosaic_0001>

<bundles_post_ra>
// kernel: mlp_forward.1
= control target key start
LH: loop header
LB: loop body
LE: loop exit
PB: predicated region body
PF: predicated region fallthrough
CT: control target
= control target key end

     0   :  { %9 = vsyncpa [#allocation3], 0  ;;  %s2180_s0 = inlined_call_operand.vmem [shape: f32[256,784], index: 0, kind: input, shape index: {}]   ;;  %s2181_s1 = inlined_call_operand.vmem [shape: bf16[784,128], index: 1, kind: input, shape index: {}]   ;;  %s2182_s2 = inlined_call_operand.vmem [shape: bf16[128,128], index: 2, kind: input, shape index: {}]   ;;  %s2183_s3 = inlined_call_operand.vmem [shape: bf16[128,128], index: 3, kind: input, shape index: {}]   ;;  %s2184_s4 = inlined_call_operand.hbm [shape: f32[256,128], index: 4, kind: output, shape index: {}]  }
   0x1   :  { %11 = vsyncpa [#allocation3 + $0x1], 0  ;;  %s1804_s15 = smov 0   ;;  %s1806_s16 = smov 0  }
   0x2   :  { %s1808_s17 = smov 0   ;;  %s1810_s18 = smov 0  }
   0x3 LB: > { %s1825_s19 = sadd.s32 4294967295, %s1774_s18   ;;  %s1318_s20 = sadd.s32 4294967294, %s1774_s18   ;;  %s1774_s18 = sphi %s1810_s18, %s2190_s18   ;;  %s1770_s17 = sphi %s1808_s17, %s2189_s17   ;;  %s1766_s16 = sphi %s1806_s16, %s2188_s16   ;;  %s1762_s15 = sphi %s1804_s15, %s2187_s15  }
   0x4   : > { %s1829_s21 = sadd.s32 1, %s1774_s18   ;;  %s113_s22 = sadd.s32 1, %s1770_s17 }
   0x5   : > { %s110_s23 = ssub.s32 %s1774_s18, %s1829_s21  ;;  %p123_p0 = scmp.ne.s32.totalorder %s1770_s17, %s1766_s16 }
   0x6   : > { %p111_p1 = scmp.eq.s32.totalorder %s110_s23, 0  ;;  %p124_p2 = scmp.eq.s32.totalorder %s1825_s19, 3 }
   0x7   : > { %p129_p3 = scmp.ne.s32.totalorder %s1766_s16, %s1762_s15  ;;  %p130_p4 = scmp.eq.s32.totalorder %s1318_s20, 3 }
   0x8   : > { %s1840_s24 = scalar_select %p111_p1, %s1770_s17, %s113_s22  }
   0x9   : > { %p1842_p5 = por %p124_p2, %p123_p0  ;;  %p1846_p6 = por %p130_p4, %p129_p3 }
   0xa   : > { %p1321_p7 = scmp.ge.s32.totalorder %s1774_s18, 1  ;;  %p167_p8 = scmp.lt.s32.totalorder %s1774_s18, 5 }
   0xc   : > { %p168_p9 = pnand %p1321_p7, %p167_p8 }
   0xd   : > { %s1323_s14 = sshll.u32 (!%p168_p9), %s1825_s19, 3  ;;  %s191_s29 = sand.u32 (!%p168_p9), 1, %s1766_s16  }
   0xe   : > { %171 = sbr.rel (%p168_p9) target bundleno = 735 (0x2df), region = 36  ;;  %p195_p10 = scmp.lt.s32.totalorder (!%p168_p9), %s1323_s14, 31 }
   0xf   : > { %s1399_s7 = sshll.u32 (!%p168_p9), %s1825_s19, 10  ;;  %s1776_s19 = smov (!%p168_p9), [#allocation2]  }
  0x10   : > { %s2138_s10 = scalar_lea.hbm (!%p168_p9), %s2184_s4, %s1399_s7  ;;  %s1718_s12 = sshll.u32 (!%p168_p9), %s1776_s19, 4  ;;  %s1719_s12 = int_to_ptr.vmem [resolvable:$false] %s1718_s12 }
  0x13   : > { %v1649_v0 = vld [vmem:[%s2181_s1 + $0x78] sm:$0xff]   ;;  %v1653_v4 = vld [vmem:[%s2181_s1 + $0x70] sm:$0xff]   ;;  %v1657_v8 = vld [vmem:[%s2181_s1 + $0x68] sm:$0xff]   ;;  %s2192_s14 = smov (!%p195_p10, %s1323_s14), 31  ;;  %vm679_vm0 = vcmask 130048  }
  0x14   : > { %v1650_v1 = vld [vmem:[%s2181_s1 + $0xf8] sm:$0xff]   ;;  %1400 = vmatprep.subr.bf16.mxu0 %v1649_v0  ;;  %v1654_v5 = vld [vmem:[%s2181_s1 + $0xf0] sm:$0xff]   ;;  %v1658_v9 = vld [vmem:[%s2181_s1 + $0xe8] sm:$0xff]   ;;  %s1607_s30 = smul.u32 56, %s2192_s14  ;;  %s1720_s14 = scalar_lea.vmem %s1719_s12, 2048 }
  0x15   : > { %v1651_v2 = vld [vmem:[%s2181_s1 + $0x38] sm:$0xff]   ;;  %1440 = vmatprep.subr.bf16.mxu1 %v1650_v1  ;;  %v1655_v6 = vld [vmem:[%s2181_s1 + $0x30] sm:$0xff]   ;;  %v1659_v10 = vld [vmem:[%s2181_s1 + $0x28] sm:$0xff]  }
  0x16   : > { %v1652_v3 = vld [vmem:[%s2181_s1 + $0xb8] sm:$0xff]   ;;  %1401 = vmatpush3.bf16.msra.mxu0 %v1651_v2  ;;  %v1656_v7 = vld [vmem:[%s2181_s1 + $0xb0] sm:$0xff]   ;;  %v1660_v11 = vld [vmem:[%s2181_s1 + $0xa8] sm:$0xff]   ;;  %s1946_s20 = scalar_lea.vmem %s2180_s0, %s1607_s30  ;;  %s1322_s30 = sshll.u32 %s191_s29, 6 }
  0x17   : > { %1441 = vmatpush3.bf16.msra.mxu1 %v1652_v3  ;;  %1402 = vmatprep.subr.bf16.mxu0 %v1653_v4  ;;  %v1661_v12 = vld [vmem:[%s2181_s1 + $0x60] sm:$0xff]   ;;  %v1665_v16 = vld [vmem:[%s2181_s1 + $0x58] sm:$0xff]   ;;  %v1669_v20 = vld [vmem:[%s2181_s1 + $0x50] sm:$0xff]   ;;  %s193_s5 = scalar_lea.vmem [#allocation2], %s1322_s30 }
  0x18   : > { %1442 = vmatprep.subr.bf16.mxu1 %v1654_v5  ;;  %v1662_v13 = vld [vmem:[%s2181_s1 + $0xe0] sm:$0xff]   ;;  %v1666_v17 = vld [vmem:[%s2181_s1 + $0xd8] sm:$0xff]   ;;  %v1670_v21 = vld [vmem:[%s2181_s1 + $0xd0] sm:$0xff]   ;;  %s1256_s6 = sshll.u32 %s193_s5, 4  ;;  %s2133_s6 = int_to_ptr.vmem [resolvable:$true] %s1256_s6 }
  0x19   : > { %v1663_v14 = vld [vmem:[%s2181_s1 + $0x20] sm:$0xff]   ;;  %v1667_v18 = vld [vmem:[%s2181_s1 + $0x18] sm:$0xff]   ;;  %v1671_v22 = vld [vmem:[%s2181_s1 + $0x10] sm:$0xff]   ;;  %s1714_s11 = scalar_lea.vmem %s2133_s6, 1024  ;;  %p1721_p0 = scmp.lt.s32.totalorder %s2133_s6, %s1719_s12 }
  0x1a   : > { %1403 = vmatpush3.bf16.msra.mxu0 %v1655_v6  ;;  %v1664_v15 = vld [vmem:[%s2181_s1 + $0xa0] sm:$0xff]   ;;  %v1668_v19 = vld [vmem:[%s2181_s1 + $0x98] sm:$0xff]   ;;  %v1672_v23 = vld [vmem:[%s2181_s1 + $0x90] sm:$0xff]   ;;  %p1715_p11 = scmp.ne.s32.totalorder %s2133_s6, %s1714_s11  ;;  %p1722_p1 = scmp.lt.s32.totalorder %s1720_s14, %s1714_s11 }
  0x1b   : > { %1443 = vmatpush3.bf16.msra.mxu1 %v1656_v7  ;;  %1404 = vmatprep.subr.bf16.mxu0 %v1657_v8  ;;  %v1673_v24 = vld [vmem:[%s2181_s1 + $0x48] sm:$0xff]   ;;  %v1677_v28 = vld [vmem:[%s2181_s1 + $0x40] sm:$0xff]   ;;  %v206_v34 = vld [vmem:[%s1946_s20 + $0x18] sm:$0xff] }
  0x1c   : > { %1444 = vmatprep.subr.bf16.mxu1 %v1658_v9  ;;  %v1674_v25 = vld [vmem:[%s2181_s1 + $0xc8] sm:$0xff]   ;;  %v1678_v29 = vld [vmem:[%s2181_s1 + $0xc0] sm:$0xff]   ;;  %v213_v36 = vld [vmem:[%s1946_s20 + $0x50] sm:$0xff]  ;;  %p1716_p12 = pnand %p1715_p11, %p1842_p5  ;;  %p1723_p2 = por %p1722_p1, %p1721_p0 }
  0x1d   : > { %v1675_v26 = vld [vmem:[%s2181_s1 + $0x8] sm:$0xff]   ;;  %v1679_v30 = vld [vmem:[%s2181_s1] sm:$0xff]   ;;  %v210_v38 = vld [vmem:[%s1946_s20 + $0x38] sm:$0xff]  ;;  %v262_v39 = vpack.c.bf16 %v213_v36, %v206_v34 }
  0x1e   : > { %1405 = vmatpush3.bf16.msra.mxu0 %v1659_v10  ;;  %v1676_v27 = vld [vmem:[%s2181_s1 + $0x88] sm:$0xff]   ;;  %v1680_v31 = vld [vmem:[%s2181_s1 + $0x80] sm:$0xff]   ;;  %v205_v41 = vld [vmem:[%s1946_s20 + $0x10] sm:$0xff]  ;;  %p1717_p13 = pneg %p1716_p12 }
  0x1f   : > { %1445 = vmatpush3.bf16.msra.mxu1 %v1660_v11  ;;  %1406 = vmatprep.subr.bf16.mxu0 %v1661_v12  ;;  %v204_v32 = vld [vmem:[%s1946_s20 + $0x8] sm:$0xff]  ;;  %v211_v33 = vld [vmem:[%s1946_s20 + $0x40] sm:$0xff]  ;;  %v1681_v44 = vld [vmem:[%s2181_s1 + $0x178] sm:$0xff]  }
  0x20   : > { %1446 = vmatprep.subr.bf16.mxu1 %v1662_v13  ;;  %v260_v35 = vpack.c.bf16 %v211_v33, %v204_v32  ;;  %v203_v37 = vld [vmem:[%s1946_s20] sm:$0xff]  ;;  %v212_v42 = vld [vmem:[%s1946_s20 + $0x48] sm:$0xff]  ;;  %789 = vmatprep.mubr.bf16.mxu1 %v262_v39  ;;  %v1682_v45 = vld [vmem:[%s2181_s1 + $0x138] sm:$0xff]   ;;  %p1724_p3 = pnand %p1723_p2, %p1717_p13 }
  0x21   : > { %v259_v40 = vpack.c.bf16 %v210_v38, %v203_v37  ;;  %v261_v43 = vpack.c.bf16 %v212_v42, %v205_v41  ;;  %v1683_v46 = vld [vmem:[%s2181_s1 + $0x170] sm:$0xff]   ;;  %v218_v48 = vld [vmem:[%s1946_s20 + $0x78] sm:$0xff]  ;;  %v220_v50 = vld [vmem:[%s1946_s20 + $0x88] sm:$0xff] }
  0x22   : > { %1407 = vmatpush3.bf16.msra.mxu0 %v1663_v14  ;;  %724 = vmatprep.mubr.bf16.mxu0 %v260_v35  ;;  %v1684_v47 = vld [vmem:[%s2181_s1 + $0x130] sm:$0xff]   ;;  %v227_v51 = vld [vmem:[%s1946_s20 + $0xc0] sm:$0xff]  ;;  %v224_v55 = vld [vmem:[%s1946_s20 + $0xa8] sm:$0xff] }
  0x23   : > { %1447 = vmatpush3.bf16.msra.mxu1 %v1664_v15  ;;  %1408 = vmatprep.subr.bf16.mxu0 %v1665_v16  ;;  %v225_v49 = vld [vmem:[%s1946_s20 + $0xb0] sm:$0xff]  ;;  %v269_v53 = vpack.c.bf16 %v227_v51, %v220_v50  ;;  %v219_v56 = vld [vmem:[%s1946_s20 + $0x80] sm:$0xff]  ;;  %v226_v58 = vld [vmem:[%s1946_s20 + $0xb8] sm:$0xff] }
  0x24   : > { %1448 = vmatprep.subr.bf16.mxu1 %v1666_v17  ;;  %v267_v52 = vpack.c.bf16 %v225_v49, %v218_v48  ;;  %v217_v54 = vld [vmem:[%s1946_s20 + $0x70] sm:$0xff]  ;;  %v268_v59 = vpack.c.bf16 %v226_v58, %v219_v56  ;;  %v1685_v60 = vld [vmem:[%s2181_s1 + $0x168] sm:$0xff]   ;;  %v1687_v62 = vld [vmem:[%s2181_s1 + $0x160] sm:$0xff]  }
  0x25   : > { %v266_v57 = vpack.c.bf16 %v224_v55, %v217_v54  ;;  %v1686_v61 = vld [vmem:[%s2181_s1 + $0x128] sm:$0xff]   ;;  %v1688_v63 = vld [vmem:[%s2181_s1 + $0x120] sm:$0xff]   ;;  %v234_v3 = vld [vmem:[%s1946_s20 + $0xf8] sm:$0xff] }
  0x26   : > { %1409 = vmatpush3.bf16.msra.mxu0 %v1667_v18  ;;  %v232_v0 = vld [vmem:[%s1946_s20 + $0xe8] sm:$0xff]  ;;  %v239_v1 = vld [vmem:[%s1946_s20 + $0x120] sm:$0xff]  ;;  %v241_v4 = vld [vmem:[%s1946_s20 + $0x130] sm:$0xff] }
  0x27   : > { %1449 = vmatpush3.bf16.msra.mxu1 %v1668_v19  ;;  %1410 = vmatprep.subr.bf16.mxu0 %v1669_v20  ;;  %v274_v2 = vpack.c.bf16 %v239_v1, %v232_v0  ;;  %v231_v5 = vld [vmem:[%s1946_s20 + $0xe0] sm:$0xff]  ;;  %v276_v6 = vpack.c.bf16 %v241_v4, %v234_v3  ;;  %v238_v7 = vld [vmem:[%s1946_s20 + $0x118] sm:$0xff]  ;;  %v233_v8 = vld [vmem:[%s1946_s20 + $0xf0] sm:$0xff] }
  0x28   : > { %1450 = vmatprep.subr.bf16.mxu1 %v1670_v21  ;;  %v240_v9 = vld [vmem:[%s1946_s20 + $0x128] sm:$0xff]  ;;  %v273_v10 = vpack.c.bf16 %v238_v7, %v231_v5  ;;  %v1689_v11 = vld [vmem:[%s2181_s1 + $0x158] sm:$0xff]   ;;  %v1691_v14 = vld [vmem:[%s2181_s1 + $0x180] sm:$0xff]  }
  0x29   : > { %v275_v12 = vpack.c.bf16 %v240_v9, %v233_v8  ;;  %v1690_v13 = vld [vmem:[%s2181_s1 + $0x118] sm:$0xff]   ;;  %v1692_v15 = vld [vmem:[%s2181_s1 + $0x150] sm:$0xff]   ;;  %v248_v19 = vld [vmem:[%s1946_s20 + $0x168] sm:$0xff] }
  0x2a   : > { %1411 = vmatpush3.bf16.msra.mxu0 %v1671_v22  ;;  %v1693_v16 = vld [vmem:[%s2181_s1 + $0x110] sm:$0xff]   ;;  %v246_v17 = vld [vmem:[%s1946_s20 + $0x158] sm:$0xff]  ;;  %v255_v21 = vld [vmem:[%s1946_s20 + $0x1a0] sm:$0xff] }
  0x2b   : > { %1451 = vmatpush3.bf16.msra.mxu1 %v1672_v23  ;;  %1412 = vmatprep.subr.bf16.mxu0 %v1673_v24  ;;  %v253_v18 = vld [vmem:[%s1946_s20 + $0x190] sm:$0xff]  ;;  %v252_v23 = vld [vmem:[%s1946_s20 + $0x188] sm:$0xff]  ;;  %v283_v24 = vpack.c.bf16 %v255_v21, %v248_v19  ;;  %v1697_v33 = vld [vmem:[%s2181_s1 + $0x100] sm:$0xff]  }
  0x2c   : > { %1452 = vmatprep.subr.bf16.mxu1 %v1674_v25  ;;  %v281_v20 = vpack.c.bf16 %v253_v18, %v246_v17  ;;  %v245_v22 = vld [vmem:[%s1946_s20 + $0x150] sm:$0xff]  ;;  %v247_v25 = vld [vmem:[%s1946_s20 + $0x160] sm:$0xff]  ;;  %v208_v32 = vld [vmem:[%s1946_s20 + $0x28] sm:$0xff] }
  0x2d   : > { %v215_v34 = vld [vmem:[%s1946_s20 + $0x60] sm:$0xff]  ;;  %v209_v37 = vld [vmem:[%s1946_s20 + $0x30] sm:$0xff]  ;;  %v216_v38 = vld [vmem:[%s1946_s20 + $0x68] sm:$0xff] }
  0x2e   : > { %1413 = vmatpush3.bf16.msra.mxu0 %v1675_v26  ;;  %v254_v26 = vld [vmem:[%s1946_s20 + $0x198] sm:$0xff]  ;;  %v264_v35 = vpack.c.bf16 %v215_v34, %v208_v32  ;;  %v207_v36 = vld [vmem:[%s1946_s20 + $0x20] sm:$0xff]  ;;  %v244_v48 = vld [vmem:[%s1946_s20 + $0x148] sm:$0xff] }
  0x2f   : > { %1453 = vmatpush3.bf16.msra.mxu1 %v1676_v27  ;;  %1414 = vmatprep.subr.bf16.mxu0 %v1677_v28  ;;  %v280_v27 = vpack.c.bf16 %v252_v23, %v245_v22  ;;  %v1694_v28 = vld [vmem:[%s2181_s1 + $0x148] sm:$0xff]   ;;  %v214_v39 = vld [vmem:[%s1946_s20 + $0x58] sm:$0xff]  ;;  %v223_v41 = vld [vmem:[%s1946_s20 + $0xa0] sm:$0xff] }
  0x30   : > { %1454 = vmatprep.subr.bf16.mxu1 %v1678_v29  ;;  %v282_v29 = vpack.c.bf16 %v254_v26, %v247_v25  ;;  %v230_v42 = vld [vmem:[%s1946_s20 + $0xd8] sm:$0xff]  ;;  %v221_v51 = vld [vmem:[%s1946_s20 + $0x90] sm:$0xff]  ;;  %v236_v55 = vld [vmem:[%s1946_s20 + $0x108] sm:$0xff] }
  0x31   : > { %v258_v54 = vld [vmem:[%s1946_s20 + $0x1b8] sm:$0xff]  ;;  %v243_v56 = vld [vmem:[%s1946_s20 + $0x140] sm:$0xff]  ;;  %v256_v3 = vld [vmem:[%s1946_s20 + $0x1a8] sm:$0xff] }
  0x32   : > { %1415 = vmatpush3.bf16.msra.mxu0 %v1679_v30  ;;  %v1695_v30 = vld [vmem:[%s2181_s1 + $0x108] sm:$0xff]   ;;  %v1698_v5 = vld [vmem:[%s2182_s2 + $0x38] sm:$0xff]   ;;  %v1701_v8 = vld [vmem:[%s2182_s2 + $0x20] sm:$0xff]  }
  0x33   : > { %1455 = vmatpush3.bf16.msra.mxu1 %v1680_v31  ;;  %1480 = vmatprep.subr.bf16.mxu0 %v1681_v44  ;;  %v1696_v31 = vld [vmem:[%s2181_s1 + $0x140] sm:$0xff]   ;;  %v229_v44 = vld [vmem:[%s1946_s20 + $0xd0] sm:$0xff]  ;;  %v1700_v7 = vld [vmem:[%s2182_s2 + $0x28] sm:$0xff]  }
  0x34   : > { %1549 = vmatprep.subr.bf16.mxu1 %v1691_v14  ;;  %v1702_v9 = vld [vmem:[%s2182_s2 + $0x18] sm:$0xff]  }
  0x35   : > { %725 = vmatmul.mubr.bf16.vlgmr.msra.gmra.mxu0 %v259_v40  ;;  %v265_v40 = vpack.c.bf16 %v216_v38, %v209_v37  ;;  %v1710_v17 = vld [vmem:[%s2183_s3 + $0x18] sm:$0xff]  }
  0x36   : > { %790 = vmatmul.mubr.bf16.vlgmr.msra.gmra.mxu1 %v261_v43  ;;  %1481 = vmatpush3.bf16.msra.mxu0 %v1682_v45  ;;  %v222_v43 = vld [vmem:[%s1946_s20 + $0x98] sm:$0xff]  ;;  %v263_v45 = vpack.c.bf16 %v214_v39, %v207_v36 }
  0x37   : > { %1482 = vmatprep.subr.bf16.mxu0 %v1683_v46  ;;  %732 = vmatprep.mubr.bf16.mxu0 %v267_v52  ;;  %v272_v46 = vpack.c.bf16 %v230_v42, %v223_v41  ;;  %v271_v49 = vpack.c.bf16 %v229_v44, %v222_v43  ;;  %v228_v52 = vld [vmem:[%s1946_s20 + $0xc8] sm:$0xff] }
  0x38   : > { %797 = vmatprep.mubr.bf16.mxu1 %v269_v53  ;;  %1550 = vmatpush3.bf16.msra.mxu1 %v1691_v14  ;;  %v251_v53 = vld [vmem:[%s1946_s20 + $0x180] sm:$0xff]  ;;  %v1707_v14 = vld [vmem:[%s2183_s3 + $0x30] sm:$0xff]  }
  0x39   : > { %v286_v58 = vpack.c.bf16 %v258_v54, %v251_v53 }
  0x3a   : > { %1483 = vmatpush3.bf16.msra.mxu0 %v1684_v47  ;;  %v237_v47 = vld [vmem:[%s1946_s20 + $0x110] sm:$0xff] }
  0x3b   : > { %1484 = vmatprep.subr.bf16.mxu0 %v1685_v60  ;;  %v279_v50 = vpack.c.bf16 %v244_v48, %v237_v47  ;;  %v235_v60 = vld [vmem:[%s1946_s20 + $0x100] sm:$0xff] }
  0x3d   : > { %733 = vmatmul.mubr.bf16.gmra.mxu0 %v266_v57  ;;  %v270_v57 = vpack.c.bf16 %v228_v52, %v221_v51 }
  0x3e   : > { %798 = vmatmul.mubr.bf16.gmra.mxu1 %v268_v59  ;;  %1485 = vmatpush3.bf16.msra.mxu0 %v1686_v61  ;;  %v278_v59 = vpack.c.bf16 %v243_v56, %v236_v55  ;;  %v242_v61 = vld [vmem:[%s1946_s20 + $0x138] sm:$0xff] }
  0x3f   : > { %1486 = vmatprep.subr.bf16.mxu0 %v1687_v62  ;;  %740 = vmatprep.mubr.bf16.mxu0 %v274_v2  ;;  %v250_v62 = vld [vmem:[%s1946_s20 + $0x178] sm:$0xff]  ;;  %v277_v0 = vpack.c.bf16 %v242_v61, %v235_v60  ;;  %v249_v2 = vld [vmem:[%s1946_s20 + $0x170] sm:$0xff] }
  0x40   : > { %805 = vmatprep.mubr.bf16.mxu1 %v276_v6  ;;  %v284_v4 = vpack.c.bf16 %v256_v3, %v249_v2  ;;  %v1699_v6 = vld [vmem:[%s2182_s2 + $0x30] sm:$0xff]  }
  0x42   : > { %1487 = vmatpush3.bf16.msra.mxu0 %v1688_v63  ;;  %v257_v63 = vld [vmem:[%s1946_s20 + $0x1b0] sm:$0xff]  ;;  %s2140_s20 = scalar_lea.sflag [#allocation3], %s191_s29 }
  0x43   : > { %1488 = vmatprep.subr.bf16.mxu0 %v1689_v11  ;;  %v285_v1 = vpack.c.bf16 %v257_v63, %v250_v62  ;;  %v1704_v11 = vld [vmem:[%s2182_s2 + $0x8] sm:$0xff]  }
  0x45   : > { %741 = vmatmul.mubr.bf16.gmra.mxu0 %v273_v10  ;;  %v1703_v10 = vld [vmem:[%s2182_s2 + $0x10] sm:$0xff]  }
  0x46   : > { %806 = vmatmul.mubr.bf16.gmra.mxu1 %v275_v12  ;;  %1489 = vmatpush3.bf16.msra.mxu0 %v1690_v13  ;;  %v1705_v12 = vld [vmem:[%s2182_s2] sm:$0xff]   ;;  %v1706_v13 = vld [vmem:[%s2183_s3 + $0x38] sm:$0xff]  }
  0x47   : > { %1490 = vmatprep.subr.bf16.mxu0 %v1692_v15  ;;  %748 = vmatprep.mubr.bf16.mxu0 %v281_v20  ;;  %v1708_v15 = vld [vmem:[%s2183_s3 + $0x28] sm:$0xff]  }
  0x48   : > { %813 = vmatprep.mubr.bf16.mxu1 %v283_v24  ;;  %1583 = vmatprep.subr.bf16.mxu1 %v1706_v13 }
  0x4a   : > { %1491 = vmatpush3.bf16.msra.mxu0 %v1693_v16  ;;  %v1709_v16 = vld [vmem:[%s2183_s3 + $0x20] sm:$0xff]  }
  0x4b   : > { %1492 = vmatprep.subr.bf16.mxu0 %v1694_v28 }
  0x4d   : > { %749 = vmatmul.mubr.bf16.gmra.mxu0 %v280_v27 }
  0x4e   : > { %814 = vmatmul.mubr.bf16.gmra.mxu1 %v282_v29  ;;  %1493 = vmatpush3.bf16.msra.mxu0 %v1695_v30 }
  0x4f   : > { %1494 = vmatprep.subr.bf16.mxu0 %v1696_v31  ;;  %854 = vmatprep.mubr.bf16.mxu0 %v264_v35 }
  0x50   : > { %1551 = vmatprep.mubr.msk.bf16.mxu1 %vm679_vm0, %v265_v40 }
  0x52   : > { %1495 = vmatpush3.bf16.msra.mxu0 %v1697_v33 }
  0x53   : > { %1559 = vmatprep.subr.bf16.mxu0 %v1698_v5 }
  0x55   : > { %855 = vmatmul.mubr.bf16.vlgmr.msra.gmra.mxu0 %v263_v45 }
  0x56   : > { %1552 = vmatmul.mubr.msk.bf16.vlgmr.msra.gmra.mxu1 %vm679_vm0, %v272_v46  ;;  %862 = vmatprep.mubr.bf16.mxu0 %v271_v49 }
  0x57   : > { %1555 = vmatprep.mubr.msk.bf16.mxu1 %vm679_vm0, %v279_v50  ;;  %1560 = vmatpush3.bf16.msra.mxu0 %v1698_v5 }
  0x58   : > { %1561 = vmatprep.subr.bf16.mxu0 %v1699_v6  ;;  %1584 = vmatpush3.bf16.msra.mxu1 %v1706_v13 }
  0x59   : > { %1585 = vmatprep.subr.bf16.mxu1 %v1707_v14 }
  0x5b   : > { %1562 = vmatpush3.bf16.msra.mxu0 %v1699_v6 }
  0x5c   : > { %1563 = vmatprep.subr.bf16.mxu0 %v1700_v7  ;;  %1586 = vmatpush3.bf16.msra.mxu1 %v1707_v14 }
  0x5d   : > { %863 = vmatmul.mubr.bf16.gmra.mxu0 %v270_v57  ;;  %1587 = vmatprep.subr.bf16.mxu1 %v1708_v15 }
  0x5e   : > { %1556 = vmatmul.mubr.msk.bf16.gmra.mxu1 %vm679_vm0, %v286_v58  ;;  %870 = vmatprep.mubr.bf16.mxu0 %v278_v59 }
  0x5f   : > { %1564 = vmatpush3.bf16.msra.mxu0 %v1700_v7 }
  0x60   : > { %1565 = vmatprep.subr.bf16.mxu0 %v1701_v8  ;;  %1588 = vmatpush3.bf16.msra.mxu1 %v1708_v15 }
  0x61   : > { %1589 = vmatprep.subr.bf16.mxu1 %v1709_v16 }
  0x63   : > { %1566 = vmatpush3.bf16.msra.mxu0 %v1701_v8 }
  0x64   : > { %1567 = vmatprep.subr.bf16.mxu0 %v1702_v9  ;;  %1590 = vmatpush3.bf16.msra.mxu1 %v1709_v16 }
  0x65   : > { %871 = vmatmul.mubr.bf16.gmra.mxu0 %v277_v0  ;;  %1591 = vmatprep.subr.bf16.mxu1 %v1710_v17 }
  0x66   : > { %878 = vmatprep.mubr.bf16.mxu0 %v285_v1 }
  0x67   : > { %1568 = vmatpush3.bf16.msra.mxu0 %v1702_v9 }
  0x68   : > { %1569 = vmatprep.subr.bf16.mxu0 %v1703_v10  ;;  %1592 = vmatpush3.bf16.msra.mxu1 %v1710_v17 }
  0x6b   : > { %1570 = vmatpush3.bf16.msra.mxu0 %v1703_v10 }
  0x6c   : > { %1571 = vmatprep.subr.bf16.mxu0 %v1704_v11 }
  0x6d   : > { %879 = vmatmul.mubr.bf16.gmra.mxu0 %v284_v4 }
  0x6f   : > { %1572 = vmatpush3.bf16.msra.mxu0 %v1704_v11 }
  0x70   : > { %1573 = vmatprep.subr.bf16.mxu0 %v1705_v12 }
  0x73   : > { %1574 = vmatpush3.bf16.msra.mxu0 %v1705_v12 }
  0xf5   : > { %v1416_v18 = vpop.f32.mrf.mxu0 }
  0xf6   : > { %v1456_v19 = vpop.f32.mrf.mxu1 }
  0xf7   : > { %v1417_v20 = vpop.f32.mrf.mxu0 }
  0xf8   : > { %v1457_v21 = vpop.f32.mrf.mxu1  ;;  %v1418_v50 = vadd.f32 %v1417_v20, %v1416_v18 }
  0xf9   : > { %v1419_v22 = vpop.f32.mrf.mxu0  ;;  %v1458_v51 = vadd.f32 %v1457_v21, %v1456_v19 }
  0xfa   : > { %v1459_v23 = vpop.f32.mrf.mxu1 }
  0xfb   : > { %v1420_v24 = vpop.f32.mrf.mxu0  ;;  %v792_v56 = vadd.f32 %v1458_v51, %v1418_v50 }
  0xfc   : > { %v1460_v25 = vpop.f32.mrf.mxu1  ;;  %v1421_v57 = vadd.f32 %v1420_v24, %v1419_v22 }
  0xfd   : > { %v1422_v26 = vpop.f32.mrf.mxu0  ;;  %v1461_v58 = vadd.f32 %v1460_v25, %v1459_v23 }
  0xfe   : > { %v1462_v27 = vpop.f32.mrf.mxu1 }
  0xff   : > { %v1423_v28 = vpop.f32.mrf.mxu0  ;;  %v795_v2 = vadd.f32 %v1461_v58, %v1421_v57 }
 0x100   : > { %v1463_v29 = vpop.f32.mrf.mxu1  ;;  %v1424_v63 = vadd.f32 %v1423_v28, %v1422_v26 }
 0x101   : > { %v1425_v30 = vpop.f32.mrf.mxu0  ;;  %v1464_v0 = vadd.f32 %v1463_v29, %v1462_v27 }
 0x102   : > { %v1465_v31 = vpop.f32.mrf.mxu1 }
 0x103   : > { %v1426_v32 = vpop.f32.mrf.mxu0  ;;  %v800_v8 = vadd.f32 %v1464_v0, %v1424_v63 }
 0x104   : > { %v1466_v33 = vpop.f32.mrf.mxu1  ;;  %v1427_v10 = vadd.f32 %v1426_v32, %v1425_v30 }
 0x105   : > { %v1428_v34 = vpop.f32.mrf.mxu0  ;;  %v1467_v11 = vadd.f32 %v1466_v33, %v1465_v31 }
 0x106   : > { %v1468_v35 = vpop.f32.mrf.mxu1 }
 0x107   : > { %v1429_v36 = vpop.f32.mrf.mxu0  ;;  %v803_v22 = vadd.f32 %v1467_v11, %v1427_v10 }
 0x108   : > { %v1469_v37 = vpop.f32.mrf.mxu1  ;;  %v1430_v19 = vadd.f32 %v1429_v36, %v1428_v34 }
 0x109   : > { %v1431_v38 = vpop.f32.mrf.mxu0  ;;  %v1470_v20 = vadd.f32 %v1469_v37, %v1468_v35 }
 0x10a   : > { %v1471_v39 = vpop.f32.mrf.mxu1 }
 0x10b   : > { %v1432_v40 = vpop.f32.mrf.mxu0  ;;  %v808_v29 = vadd.f32 %v1470_v20, %v1430_v19 }
 0x10c   : > { %v1472_v41 = vpop.f32.mrf.mxu1  ;;  %v1433_v31 = vadd.f32 %v1432_v40, %v1431_v38 }
 0x10d   : > { %v2104_v42 = vpop.f32.mrf.mxu0  ;;  %v1473_v32 = vadd.f32 %v1472_v41, %v1471_v39 }
 0x10e   : > { %v2106_v43 = vpop.f32.mrf.mxu1 }
 0x10f   : > { %v1435_v44 = vpop.f32.mrf.mxu0 }
 0x110   : > { %v1475_v45 = vpop.f32.mrf.mxu1  ;;  %v1436_v36 = vadd.f32 %v1435_v44, %v2104_v42 }
 0x111   : > { %v2108_v46 = vpop.f32.mrf.mxu0  ;;  %v1476_v37 = vadd.f32 %v1475_v45, %v2106_v43 }
 0x112   : > { %v2110_v47 = vpop.f32.mrf.mxu1 }
 0x113   : > { %v2112_v48 = vpop.f32.mrf.mxu0  ;;  %v816_v39 = vadd.f32 %v1476_v37, %v1436_v36 }
 0x114   : > { %v2114_v49 = vpop.f32.mrf.mxu1  ;;  %v1439_v41 = vadd.f32 %v2112_v48, %v2108_v46  ;;  %v1712_v48 = vld [vmem:[%s2183_s3 + $0x8] sm:$0xff]  }
 0x115   : > { %v1496_v52 = vpop.f32.mrf.mxu0 }
 0x116   : > { %v1553_v53 = vpop.f32.mrf.mxu1 }
 0x117   : > { %v1497_v54 = vpop.f32.mrf.mxu0 }
 0x118   : > { %v921_v55 = vpop.f32.mrf.mxu1  ;;  %v1498_v59 = vadd.f32 %v1497_v54, %v1496_v52 }
 0x119   : > { %v1499_v60 = vpop.f32.mrf.mxu0 }
 0x11a   : > { %v1554_v61 = vpop.f32.mrf.mxu1  ;;  %v857_v62 = vadd.f32 %v1498_v59, %v792_v56  ;;  %v811_v56 = vadd.f32 %v1473_v32, %v1433_v31 }
 0x11b   : > { %v1500_v1 = vpop.f32.mrf.mxu0 }
 0x11c   : > { %v1501_v3 = vadd.f32 %v1500_v1, %v1499_v60  ;;  %v924_v5 = vpop.f32.mrf.mxu1  ;;  %v922_v6 = vadd.f32 %v921_v55, %v857_v62 }
 0x11d   : > { %v1502_v4 = vpop.f32.mrf.mxu0 }
 0x11e   : > { %v860_v7 = vadd.f32 %v1501_v3, %v795_v2  ;;  %v1557_v15 = vpop.f32.mrf.mxu1  ;;  %v952_v16 = vmax.f32 %v922_v6, 0.0 }
 0x11f   : > { %v1503_v9 = vpop.f32.mrf.mxu0 }
 0x120   : > { %v1504_v12 = vadd.f32 %v1503_v9, %v1502_v4  ;;  %v925_v13 = vadd.f32 %v924_v5, %v860_v7  ;;  %v937_v26 = vpop.f32.mrf.mxu1 }
 0x121   : > { %v1505_v14 = vpop.f32.mrf.mxu0 }
 0x122   : > { %v865_v17 = vadd.f32 %v1504_v12, %v800_v8  ;;  %v953_v18 = vmax.f32 %v925_v13, 0.0  ;;  %v1558_v52 = vpop.f32.mrf.mxu1 }
 0x123   : > { %v1506_v21 = vpop.f32.mrf.mxu0 }
 0x124   : > { %v960_v23 = vpack.c.bf16 %v953_v18, %v952_v16  ;;  %v1507_v24 = vadd.f32 %v1506_v21, %v1505_v14  ;;  %v930_v27 = vadd.f32 %v1553_v53, %v865_v17  ;;  %v940_v59 = vpop.f32.mrf.mxu1 }
 0x125   : > { %v1508_v25 = vpop.f32.mrf.mxu0 }
 0x126   : > { %v868_v28 = vadd.f32 %v1507_v24, %v803_v22  ;;  %1575 = vmatprep.mubr.bf16.mxu0 %v960_v23  ;;  %v954_v54 = vmax.f32 %v930_v27, 0.0 }
 0x127   : > { %v1509_v30 = vpop.f32.mrf.mxu0 }
 0x128   : > { %v933_v33 = vadd.f32 %v1554_v61, %v868_v28  ;;  %v1510_v50 = vadd.f32 %v1509_v30, %v1508_v25  ;;  %v1479_v61 = vadd.f32 %v2114_v49, %v2110_v47  ;;  %v1711_v47 = vld [vmem:[%s2183_s3 + $0x10] sm:$0xff]   ;;  %v1713_v49 = vld [vmem:[%s2183_s3] sm:$0xff]  }
 0x129   : > { %v1511_v51 = vpop.f32.mrf.mxu0  ;;  %1593 = vmatprep.subr.bf16.mxu1 %v1711_v47 }
 0x12a   : > { %v955_v34 = vmax.f32 %v933_v33, 0.0  ;;  %v873_v35 = vadd.f32 %v1510_v50, %v808_v29  ;;  %v819_v1 = vadd.f32 %v1479_v61, %v1439_v41  ;;  %1594 = vmatpush3.bf16.msra.mxu1 %v1711_v47 }
 0x12b   : > { %v1512_v55 = vpop.f32.mrf.mxu0  ;;  %1595 = vmatprep.subr.bf16.mxu1 %v1712_v48 }
 0x12c   : > { %v961_v53 = vpack.c.bf16 %v955_v34, %v954_v54  ;;  %v1513_v57 = vadd.f32 %v1512_v55, %v1511_v51  ;;  %v938_v60 = vadd.f32 %v937_v26, %v873_v35 }
 0x12d   : > { %v1514_v58 = vpop.f32.mrf.mxu0 }
 0x12e   : > { %1576 = vmatmul.mubr.bf16.vlgmr.msra.gmra.mxu0 %v961_v53  ;;  %v876_v38 = vadd.f32 %v1513_v57, %v811_v56  ;;  %v956_v45 = vmax.f32 %v938_v60, 0.0  ;;  %1596 = vmatpush3.bf16.msra.mxu1 %v1712_v48 }
 0x12f   : > { %v1515_v40 = vpop.f32.mrf.mxu0  ;;  %1597 = vmatprep.subr.bf16.mxu1 %v1713_v49 }
 0x130   : > { %v1516_v42 = vadd.f32 %v1515_v40, %v1514_v58  ;;  %v941_v44 = vadd.f32 %v940_v59, %v876_v38 }
 0x131   : > { %v1517_v43 = vpop.f32.mrf.mxu0 }
 0x132   : > { %v881_v62 = vadd.f32 %v1516_v42, %v816_v39  ;;  %v957_v63 = vmax.f32 %v941_v44, 0.0  ;;  %1598 = vmatpush3.bf16.msra.mxu1 %v1713_v49 }
 0x133   : > { %v1518_v0 = vpop.f32.mrf.mxu0 }
 0x134   : > { %v962_v2 = vpack.c.bf16 %v957_v63, %v956_v45  ;;  %v1519_v3 = vadd.f32 %v1518_v0, %v1517_v43  ;;  %v946_v4 = vadd.f32 %v1557_v15, %v881_v62 }
 0x136   : > { %v884_v5 = vadd.f32 %v1519_v3, %v819_v1  ;;  %1579 = vmatprep.mubr.bf16.mxu0 %v962_v2  ;;  %v958_v7 = vmax.f32 %v946_v4, 0.0 }
 0x138   : > { %v949_v6 = vadd.f32 %v1558_v52, %v884_v5 }
 0x13a   : > { %v959_v8 = vmax.f32 %v949_v6, 0.0 }
 0x13c   : > { %v963_v46 = vpack.c.bf16 %v959_v8, %v958_v7 }
 0x13e   : > { %1580 = vmatmul.mubr.bf16.gmra.mxu0 %v963_v46 }
 0x1ee   : > { %v1577_v9 = vpop.f32.mrf.mxu0 }
 0x1ef   : > { %v1095_v16 = vmax.f32 %v1577_v9, 0.0 }
 0x1f0   : > { %v1062_v10 = vpop.f32.mrf.mxu0 }
 0x1f1   : > { %v1093_v14 = vmax.f32 %v1062_v10, 0.0 }
 0x1f2   : > { %v1578_v11 = vpop.f32.mrf.mxu0 }
 0x1f3   : > { %v1096_v12 = vmax.f32 %v1578_v11, 0.0 }
 0x1f4   : > { %v1065_v13 = vpop.f32.mrf.mxu0 }
 0x1f5   : > { %v1094_v15 = vmax.f32 %v1065_v13, 0.0  ;;  %v1102_v18 = vpack.c.bf16 %v1096_v12, %v1095_v16 }
 0x1f7   : > { %v1101_v17 = vpack.c.bf16 %v1094_v15, %v1093_v14 }
 0x1f9   : > { %1599 = vmatprep.mubr.bf16.mxu1 %v1101_v17 }
 0x1fa   : > { %1600 = vmatmul.mubr.bf16.vlgmr.msra.gmra.mxu1 %v1102_v18 }
 0x1fe   : > { %v1581_v19 = vpop.f32.mrf.mxu0 }
 0x1ff   : > { %v1099_v26 = vmax.f32 %v1581_v19, 0.0 }
 0x200   : > { %v1078_v20 = vpop.f32.mrf.mxu0 }
 0x201   : > { %v1097_v24 = vmax.f32 %v1078_v20, 0.0 }
 0x202   : > { %v1582_v21 = vpop.f32.mrf.mxu0 }
 0x203   : > { %v1100_v22 = vmax.f32 %v1582_v21, 0.0 }
 0x204   : > { %v1081_v23 = vpop.f32.mrf.mxu0 }
 0x205   : > { %v1098_v25 = vmax.f32 %v1081_v23, 0.0  ;;  %v1104_v28 = vpack.c.bf16 %v1100_v22, %v1099_v26 }
 0x207   : > { %v1103_v27 = vpack.c.bf16 %v1098_v25, %v1097_v24 }
 0x209   : > { %1603 = vmatprep.mubr.bf16.mxu1 %v1103_v27 }
 0x20a   : > { %1604 = vmatmul.mubr.bf16.gmra.mxu1 %v1104_v28 }
 0x2ba   : > { %v1601_v29 = vpop.f32.mrf.mxu1 }
 0x2bb   : > { %1236 = vst [vmem:[%s193_s5 + $0x10] sm:$0xff] %v1601_v29 }
 0x2bc   : > { %v1203_v30 = vpop.f32.mrf.mxu1 }
 0x2bd   : > { %1234 = vst [vmem:[%s193_s5] sm:$0xff] %v1203_v30 }
 0x2be   : > { %v1602_v31 = vpop.f32.mrf.mxu1 }
 0x2bf   : > { %1237 = vst [vmem:[%s193_s5 + $0x18] sm:$0xff] %v1602_v31 }
 0x2c0   : > { %v1206_v32 = vpop.f32.mrf.mxu1 }
 0x2c1   : > { %1235 = vst [vmem:[%s193_s5 + $0x8] sm:$0xff] %v1206_v32 }
 0x2ca   : > { %v1605_v33 = vpop.f32.mrf.mxu1 }
 0x2cb   : > { %1240 = vst [vmem:[%s193_s5 + $0x30] sm:$0xff] %v1605_v33 }
 0x2cc   : > { %v1219_v50 = vpop.f32.mrf.mxu1 }
 0x2cd   : > { %1238 = vst [vmem:[%s193_s5 + $0x20] sm:$0xff] %v1219_v50 }
 0x2ce   : > { %v1606_v51 = vpop.f32.mrf.mxu1 }
 0x2cf   : > { %1241 = vst [vmem:[%s193_s5 + $0x38] sm:$0xff] %v1606_v51 }
 0x2d0   : > { %v1222_v52 = vpop.f32.mrf.mxu1 }
 0x2d1   : > { %1239 = vst [vmem:[%s193_s5 + $0x28] sm:$0xff] %v1222_v52 }
 0x2d2   : > { %1727 = shalt.err (!%p1724_p3)
}
 0x2d3   : > { %s1728_s13 = scalar_lea.hbm %s2138_s10, 1024  ;;  %s1732_s27 = scalar_lea.hbm %s2184_s4, 4096 }
 0x2d4   : > { %p1729_p4 = scmp.ne.s32.totalorder %s2138_s10, %s1728_s13  ;;  %p1733_p9 = scmp.lt.s32.totalorder %s2138_s10, %s2184_s4 }
 0x2d5   : > { %p1734_p10 = scmp.lt.s32.totalorder %s1732_s27, %s1728_s13 }
 0x2d6   : > { %p1730_p7 = pnand %p1729_p4, %p1842_p5 }
 0x2d7   : > { %p1735_p11 = por %p1734_p10, %p1733_p9 }
 0x2d8   : > { %p1731_p8 = pneg %p1730_p7 }
 0x2da   : > { %p1736_p12 = pnand %p1735_p11, %p1731_p8 }
 0x2dc   : > { %1739 = shalt.err (!%p1736_p12)
}
 0x2dd   : > { %s1777_s30 = smov 128   ;;  %s1778_s5 = smov 8  }
 0x2de   : > { %1608 = dma.vmem_to_hbm [thread:$0]  (%p1842_p5), %s2133_s6, 1024, %s2138_s10, %s2140_s20, %s1777_s30, %s1777_s30, %s1778_s5  }
 0x2df PF: > { %p1614_p13 = scmp.ge.s32.totalorder %s1774_s18, 2  ;;  %s1271_s7 = sand.u32 1, %s1762_s15  }
 0x2e0   : > { %s1272_s8 = scalar_lea.sflag [#allocation3], %s1271_s7 }
 0x2e1   : > { %p1611_p0 = pnand %p1614_p13, %p1846_p6 }
 0x2e3   : > { %p1612_p1 = pneg %p1611_p0 }
 0x2e5   : > { %1757 = dma.done.wait (%p1612_p1), %s1272_s8, 1024  }
 0x2e6   : > { %1759 = vsyncadd (%p1612_p1), %s1272_s8, 4294966272  ;;  %p14_p2 = scmp.ge.s32.totalorder %s1829_s21, 6   ;;  %s2187_s15 = smov %s1766_s16 }
 0x2e7   : > { %s2188_s16 = smov %s1770_s17  ;;  %s2189_s17 = smov %s1840_s24 }
 0x2e8   : > { %s2190_s18 = smov %s1829_s21  ;;  %16 = sbr.rel (!%p14_p2) target bundleno = 3 (0x3), region = 71 }
 0x2ed   :  { %1277 = vsyncpa [#allocation3], 1 }
 0x2ee   :  { %1279 = vsyncpa [#allocation3 + $0x1], 1 }

</bundles_post_ra>
